<compile_context>
chip_gen: v5e
topology: v5e:2x2
jax: 0.10.0
libtpu: 0.0.40
codegen_flags: <defaults>
</compile_context>

<pallas_src>
import math

import jax
import jax.numpy as jnp
from jax.experimental import pallas as pl
from jax.experimental.pallas import tpu as pltpu


def _round_up(x, m):
    return ((x + m - 1) // m) * m


def _flatnet_kernel(x_ref, wt_ref, b_ref, o_ref, acc_ref):
    """One (tm, tn) output tile; K is the innermost (reduction) grid axis."""
    k = pl.program_id(2)

    @pl.when(k == 0)
    def _():
        acc_ref[...] = jnp.zeros_like(acc_ref)

    # MXU matmul with f32 accumulation.
    acc_ref[...] += jnp.dot(
        x_ref[...], wt_ref[...], preferred_element_type=jnp.float32
    )

    @pl.when(k == pl.num_programs(2) - 1)
    def _():
        # Bias added exactly once per output tile, then cast-store.
        o_ref[...] = (acc_ref[...] + b_ref[...]).astype(o_ref.dtype)


def flatnet_forward(x, weight_t, bias, *, tm=256, tn=256, tk=512):
    """Pallas implementation of FlatNet.forward.

    Args:
      x:        (batch, d_inputs) float32
      weight_t: (d_inputs, d_outputs) float32  (pre-transposed nn.Linear weight)
      bias:     (d_outputs,) float32
    Returns:
      (batch, d_outputs) float32 == x @ weight_t + bias
    """
    batch, d_inputs = x.shape
    k_dim, d_outputs = weight_t.shape
    assert k_dim == d_inputs, "weight_t must be (d_inputs, d_outputs)"

    # Adapt tile sizes to the (padded) problem while keeping TPU (8, 128)
    # alignment: lane dims (tk for x, tn for w/out) are multiples of 128,
    # sublane dims multiples of 8.
    tm = min(tm, _round_up(batch, 8))
    tn = min(tn, _round_up(d_outputs, 128))
    tk = min(tk, _round_up(d_inputs, 128))

    m_pad = _round_up(batch, tm)
    k_pad = _round_up(d_inputs, tk)
    n_pad = _round_up(d_outputs, tn)

    # Zero-pad to tile multiples (padded K rows/cols contribute 0 to the dot;
    # padded M/N are sliced off below).  Lane-dense N >= 128 avoids masked
    # partial stores.
    if m_pad != batch or k_pad != d_inputs:
        x = jnp.pad(x, ((0, m_pad - batch), (0, k_pad - d_inputs)))
    if k_pad != d_inputs or n_pad != d_outputs:
        weight_t = jnp.pad(
            weight_t, ((0, k_pad - d_inputs), (0, n_pad - d_outputs))
        )
    b2 = bias.reshape(1, d_outputs)
    if n_pad != d_outputs:
        b2 = jnp.pad(b2, ((0, 0), (0, n_pad - d_outputs)))

    grid = (m_pad // tm, n_pad // tn, k_pad // tk)

    out = pl.pallas_call(
        _flatnet_kernel,
        out_shape=jax.ShapeDtypeStruct((m_pad, n_pad), x.dtype),
        grid_spec=pltpu.PrefetchScalarGridSpec(
            num_scalar_prefetch=0,
            grid=grid,
            in_specs=[
                pl.BlockSpec((tm, tk), lambda i, j, k: (i, k)),
                pl.BlockSpec((tk, tn), lambda i, j, k: (k, j)),
                pl.BlockSpec((1, tn), lambda i, j, k: (0, j)),
            ],
            out_specs=pl.BlockSpec((tm, tn), lambda i, j, k: (i, j)),
            scratch_shapes=[pltpu.VMEM((tm, tn), jnp.float32)],
        ),
        compiler_params=pltpu.CompilerParams(
            dimension_semantics=("parallel", "parallel", "arbitrary"),
            vmem_limit_bytes=32 * 1024 * 1024,
        ),
    )(x, weight_t, b2)

    return out[:batch, :d_outputs]


def init_flatnet_params(key, d_inputs, d_outputs, dtype=jnp.float32):
    """Parameter init matching FlatNet.__init__ semantics.

    Returns the weight already transposed to (d_inputs, d_outputs) so no
    per-forward-call transpose is ever emitted (iid normal entries, so the
    distribution is identical to transposing the PyTorch-layout weight).
    """
    k_w, k_b = jax.random.split(key)
    # kaiming_normal_(mode='fan_in'), a=0 -> gain=sqrt(2); fan_in = d_inputs.
    std = math.sqrt(2.0) / math.sqrt(d_inputs)
    weight_t = std * jax.random.normal(k_w, (d_inputs, d_outputs), dtype=dtype)
    # nn.Linear default bias init: uniform(-1/sqrt(fan_in), 1/sqrt(fan_in)).
    bound = 1.0 / math.sqrt(d_inputs)
    bias = jax.random.uniform(
        k_b, (d_outputs,), dtype=dtype, minval=-bound, maxval=bound
    )
    return weight_t, bias


if __name__ == "__main__":
    forward = jax.jit(flatnet_forward)

    key = jax.random.PRNGKey(0)

    # --- Check 1: the small FlatNet-style example (exercises lane padding) ---
    k_x, k_p = jax.random.split(key)
    batch, d_inputs, d_outputs = 8, 32, 16
    x = jax.random.normal(k_x, (batch, d_inputs), dtype=jnp.float32)
    weight_t, bias = init_flatnet_params(k_p, d_inputs, d_outputs)

    y = forward(x, weight_t, bias)
    jax.block_until_ready(y)

    y_ref = (
        jnp.dot(x, weight_t, precision=jax.lax.Precision.HIGHEST) + bias
    )
    assert y.shape == (batch, d_outputs)
    assert jnp.allclose(y, y_ref, atol=1e-2, rtol=1e-2)

    # --- Check 2: multi-tile K (grid k=2) + non-aligned M/N padding ---
    k_x2, k_p2 = jax.random.split(jax.random.PRNGKey(1))
    batch2, d_inputs2, d_outputs2 = 200, 600, 130
    x2 = jax.random.normal(k_x2, (batch2, d_inputs2), dtype=jnp.float32)
    weight_t2, bias2 = init_flatnet_params(k_p2, d_inputs2, d_outputs2)

    y2 = forward(x2, weight_t2, bias2)
    jax.block_until_ready(y2)

    y2_ref = (
        jnp.dot(x2, weight_t2, precision=jax.lax.Precision.HIGHEST) + bias2
    )
    assert y2.shape == (batch2, d_outputs2)
    assert jnp.allclose(y2, y2_ref, atol=1e-2, rtol=1e-2)

    print("KERNEL_OK")
</pallas_src>

<mosaic_0001>
module attributes {stable_mosaic.version = 11 : i64} {
  func.func @_flatnet_kernel(%arg0: i32, %arg1: i32, %arg2: i32, %arg3: memref<8x128xf32, #tpu.memory_space<vmem>>, %arg4: memref<128x128xf32, #tpu.memory_space<vmem>>, %arg5: memref<1x128xf32, #tpu.memory_space<vmem>>, %arg6: memref<8x128xf32, #tpu.memory_space<vmem>>, %arg7: memref<8x128xf32, #tpu.memory_space<vmem>>) attributes {dimension_semantics = [#tpu.dimension_semantics<parallel>, #tpu.dimension_semantics<parallel>, #tpu.dimension_semantics<arbitrary>], iteration_bounds = array<i64: 1, 1, 1>, scalar_prefetch = 0 : i64, scratch_operands = 1 : i64, tpu.core_type = #tpu.core_type<tc>, window_params = [{transform_indices = @transform_0, window_bounds = array<i64: 8, 128>}, {transform_indices = @transform_1, window_bounds = array<i64: 128, 128>}, {transform_indices = @transform_2, window_bounds = array<i64: 1, 128>}, {transform_indices = @transform_3, window_bounds = array<i64: 8, 128>}]} {
    %c0_i32 = arith.constant 0 : i32
    %0 = arith.cmpi eq, %arg2, %c0_i32 : i32
    %1 = arith.extui %0 : i1 to i32
    %c0_i32_0 = arith.constant 0 : i32
    %2 = arith.cmpi ne, %1, %c0_i32_0 : i32
    scf.if %2 {
      %cst_10 = arith.constant 0.000000e+00 : f32
      %12 = vector.broadcast %cst_10 : f32 to vector<8x128xf32>
      %c0_11 = arith.constant 0 : index
      %c0_12 = arith.constant 0 : index
      %13 = vector.load %arg7[%c0_11, %c0_12] : memref<8x128xf32, #tpu.memory_space<vmem>>, vector<8x128xf32>
      tpu.vector_store %arg7[%c0_11, %c0_12], %12 {strides = array<i32>} : memref<8x128xf32, #tpu.memory_space<vmem>>, vector<8x128xf32>,
    } else {
    }
    %c0 = arith.constant 0 : index
    %c0_1 = arith.constant 0 : index
    %3 = vector.load %arg7[%c0, %c0_1] : memref<8x128xf32, #tpu.memory_space<vmem>>, vector<8x128xf32>
    %c0_2 = arith.constant 0 : index
    %c0_3 = arith.constant 0 : index
    %4 = vector.load %arg3[%c0_2, %c0_3] : memref<8x128xf32, #tpu.memory_space<vmem>>, vector<8x128xf32>
    %c0_4 = arith.constant 0 : index
    %c0_5 = arith.constant 0 : index
    %5 = vector.load %arg4[%c0_4, %c0_5] : memref<128x128xf32, #tpu.memory_space<vmem>>, vector<128x128xf32>
    %cst = arith.constant dense<0.000000e+00> : vector<8x128xf32>
    %6 = tpu.matmul %4, %5, %cst {dimension_numbers = #tpu.dot_dimension_numbers<[1], [0], [0], [1], [0, 0, 1, 1], [], []>} : vector<8x128xf32>, vector<128x128xf32>, vector<8x128xf32> -> vector<8x128xf32>
    %7 = arith.addf %3, %6 : vector<8x128xf32>
    %c0_6 = arith.constant 0 : index
    %c0_7 = arith.constant 0 : index
    %8 = vector.load %arg7[%c0_6, %c0_7] : memref<8x128xf32, #tpu.memory_space<vmem>>, vector<8x128xf32>
    tpu.vector_store %arg7[%c0_6, %c0_7], %7 {strides = array<i32>} : memref<8x128xf32, #tpu.memory_space<vmem>>, vector<8x128xf32>,
    %c0_i32_8 = arith.constant 0 : i32
    %9 = arith.cmpi eq, %arg2, %c0_i32_8 : i32
    %10 = arith.extui %9 : i1 to i32
    %c0_i32_9 = arith.constant 0 : i32
    %11 = arith.cmpi ne, %10, %c0_i32_9 : i32
    scf.if %11 {
      %c0_10 = arith.constant 0 : index
      %c0_11 = arith.constant 0 : index
      %12 = vector.load %arg7[%c0_10, %c0_11] : memref<8x128xf32, #tpu.memory_space<vmem>>, vector<8x128xf32>
      %c0_12 = arith.constant 0 : index
      %c0_13 = arith.constant 0 : index
      %13 = vector.load %arg5[%c0_12, %c0_13] : memref<1x128xf32, #tpu.memory_space<vmem>>, vector<1x128xf32>
      %14 = vector.broadcast %13 : vector<1x128xf32> to vector<8x128xf32>
      %15 = arith.addf %12, %14 : vector<8x128xf32>
      %c0_14 = arith.constant 0 : index
      %c0_15 = arith.constant 0 : index
      %16 = vector.load %arg6[%c0_14, %c0_15] : memref<8x128xf32, #tpu.memory_space<vmem>>, vector<8x128xf32>
      tpu.vector_store %arg6[%c0_14, %c0_15], %15 {strides = array<i32>} : memref<8x128xf32, #tpu.memory_space<vmem>>, vector<8x128xf32>,
    } else {
    }
    return
  }
  func.func @transform_0(%arg0: i32, %arg1: i32, %arg2: i32) -> (i32, i32) {
    %c0_i32 = arith.constant 0 : i32
    return %arg0, %arg2 : i32, i32
  }
  func.func @transform_1(%arg0: i32, %arg1: i32, %arg2: i32) -> (i32, i32) {
    %c0_i32 = arith.constant 0 : i32
    return %arg2, %arg1 : i32, i32
  }
  func.func @transform_2(%arg0: i32, %arg1: i32, %arg2: i32) -> (i32, i32) {
    %c0_i32 = arith.constant 0 : i32
    %c0_i32_0 = arith.constant 0 : i32
    return %c0_i32, %arg1 : i32, i32
  }
  func.func @transform_3(%arg0: i32, %arg1: i32, %arg2: i32) -> (i32, i32) {
    %c0_i32 = arith.constant 0 : i32
    return %arg0, %arg1 : i32, i32
  }
}

</mosaic_0001>

<bundles_post_ra>
// kernel: flatnet_forward.1
= control target key start
LH: loop header
LB: loop body
LE: loop exit
PB: predicated region body
PF: predicated region fallthrough
CT: control target
= control target key end

     0   :  { %s192_s0 = inlined_call_operand.vmem [shape: f32[8,128], index: 0, kind: input, shape index: {}]   ;;  %s193_s1 = inlined_call_operand.vmem [shape: f32[128,128], index: 1, kind: input, shape index: {}]   ;;  %s194_s2 = inlined_call_operand.vmem [shape: f32[1,128], index: 2, kind: input, shape index: {}]   ;;  %s195_s3 = inlined_call_operand.hbm [shape: f32[8,128], index: 3, kind: output, shape index: {}]  }
   0x1   :  { %v37_v0 = vld [vmem:[%s193_s1 + $0x78] sm:$0xff]  ;;  %v36_v1 = vld [vmem:[%s193_s1 + $0x70] sm:$0xff]  ;;  %v35_v2 = vld [vmem:[%s193_s1 + $0x68] sm:$0xff] }
   0x2   :  { %38 = vmatpush.msra.mxu0 %v37_v0  ;;  %v34_v3 = vld [vmem:[%s193_s1 + $0x60] sm:$0xff]  ;;  %v33_v4 = vld [vmem:[%s193_s1 + $0x58] sm:$0xff] }
   0x4   :  { %39 = vmatpush.msra.mxu0 %v36_v1 }
   0x6   :  { %40 = vmatpush.msra.mxu0 %v35_v2 }
   0x7   :  { %8 = vsyncpa [#allocation4], 0  ;;  %v32_v5 = vld [vmem:[%s193_s1 + $0x50] sm:$0xff]  ;;  %v31_v6 = vld [vmem:[%s193_s1 + $0x48] sm:$0xff]  ;;  %s114_s21 = smov [#allocation3]   ;;  %s77_s25 = sshll.u32 %s195_s3, 4  ;;  %s78_s25 = int_to_ptr.hbm [resolvable:$true] %s77_s25 }
   0x8   :  { %41 = vmatpush.msra.mxu0 %v34_v3  ;;  %v30_v7 = vld [vmem:[%s193_s1 + $0x40] sm:$0xff]  ;;  %v29_v8 = vld [vmem:[%s193_s1 + $0x38] sm:$0xff]  ;;  %v28_v9 = vld [vmem:[%s193_s1 + $0x30] sm:$0xff]  ;;  %s75_s22 = sshll.u32 %s114_s21, 4  ;;  %s76_s22 = int_to_ptr.vmem [resolvable:$true] %s75_s22 }
   0x9   :  { %v27_v10 = vld [vmem:[%s193_s1 + $0x28] sm:$0xff]  ;;  %v26_v11 = vld [vmem:[%s193_s1 + $0x20] sm:$0xff]  ;;  %v25_v12 = vld [vmem:[%s193_s1 + $0x18] sm:$0xff] }
   0xa   :  { %42 = vmatpush.msra.mxu0 %v33_v4  ;;  %v24_v13 = vld [vmem:[%s193_s1 + $0x10] sm:$0xff]  ;;  %v23_v14 = vld [vmem:[%s193_s1 + $0x8] sm:$0xff]  ;;  %v22_v15 = vld [vmem:[%s193_s1] sm:$0xff] }
   0xb   :  { %v21_v16 = vld [vmem:[%s192_s0] sm:$0xff] }
   0xc   :  { %43 = vmatpush.msra.mxu0 %v32_v5  ;;  %v87_v17 = vld [vmem:[%s194_s2] ss:$0 sm:$0xff] }
   0xe   :  { %44 = vmatpush.msra.mxu0 %v31_v6 }
  0x10   :  { %45 = vmatpush.msra.mxu0 %v30_v7 }
  0x12   :  { %46 = vmatpush.msra.mxu0 %v29_v8 }
  0x14   :  { %47 = vmatpush.msra.mxu0 %v28_v9 }
  0x16   :  { %48 = vmatpush.msra.mxu0 %v27_v10 }
  0x18   :  { %49 = vmatpush.msra.mxu0 %v26_v11 }
  0x1a   :  { %50 = vmatpush.msra.mxu0 %v25_v12 }
  0x1c   :  { %51 = vmatpush.msra.mxu0 %v24_v13 }
  0x1e   :  { %52 = vmatpush.msra.mxu0 %v23_v14 }
  0x20   :  { %53 = vmatpush.msra.mxu0 %v22_v15 }
  0x21   :  { %54 = vmatmul.f32.vlgmr.msra.gmra.mxu0 %v21_v16 }
  0x9e   :  { %v55_v18 = vpop.f32.mrf.mxu0 }
  0x9f   :  { %v68_v19 = vadd.f32 %v87_v17, %v55_v18 }
  0xa1   :  { %69 = vst [vmem:[#allocation3] sm:$0xff] %v68_v19 }
  0xa2   :  { %80 = dma.vmem_to_hbm [thread:$0]  %s76_s22, 128, %s78_s25, [#allocation4]  }
  0xa3   :  { %112 = dma.done.wait [#allocation4], 128  }
  0xa4   :  { %113 = vsyncadd [#allocation4], 4294967168 }
  0xa5   :  { %85 = vsyncpa [#allocation4], 1 }

</bundles_post_ra>
